<compile_context>
chip_gen: v7x
topology: tpu7x:2x2x1
jax: 0.10.0
libtpu: 0.0.40
codegen_flags: <defaults>
</compile_context>

<pallas_src>
import jax
import jax.numpy as jnp
from jax.experimental import pallas as pl
from jax.experimental.pallas import tpu as pltpu


def _round_up(x: int, m: int) -> int:
    return (x + m - 1) // m * m


def critic_kernel(x_ref, w1_ref, b1_ref, w2_ref, b2_ref, wo_ref, bo_ref, out_ref):
    """One batch tile: obs -> tanh(L1) -> tanh(L2) -> value (lane-dense store)."""
    x = x_ref[...]                                              # (TB, dim_obs)
    h1 = jnp.tanh(
        jnp.dot(x, w1_ref[...], preferred_element_type=jnp.float32) + b1_ref[...]
    )                                                           # (TB, H1)
    h2 = jnp.tanh(
        jnp.dot(h1, w2_ref[...], preferred_element_type=jnp.float32) + b2_ref[...]
    )                                                           # (TB, H2)
    # Output layer has out_features == 1: do a VPU multiply + cross-lane (XLU)
    # reduction instead of an MXU pass with a 1-wide result, and store with the
    # batch on the lane axis (dense, unmasked vst).
    v = jnp.sum(h2 * wo_ref[...], axis=-1) + bo_ref[0]          # (TB,)
    out_ref[0, :] = v                                           # (1, TB) block


def critic_forward(x, params, *, block_b: int = 512):
    """x: [B, dim_obs] float32 -> value [B, 1] float32."""
    w1, b1, w2, b2 = params["w1"], params["b1"], params["w2"], params["b2"]
    wo_row = params["wo"].reshape(1, -1)      # (1, H2) row form of (H2, 1) weight
    bo = params["bo"].reshape(-1)             # (1,) scalar bias -> SMEM

    B, dim_obs = x.shape

    # Batch tile: multiple of 128 so the (1, TB) output block is lane-dense and
    # sublane loads of x are unmasked; pad B up to a whole number of tiles.
    tb = min(_round_up(block_b, 128), _round_up(B, 128))
    b_pad = _round_up(B, tb)
    if b_pad != B:
        x = jnp.pad(x, ((0, b_pad - B), (0, 0)))

    def resident(arr):
        # Tiny parameter arrays: single full block + constant index_map, so the
        # block stays resident in VMEM across all grid steps (no re-DMA).
        return pl.BlockSpec(arr.shape, lambda i: (0,) * arr.ndim)

    out = pl.pallas_call(
        critic_kernel,
        out_shape=jax.ShapeDtypeStruct((1, b_pad), jnp.float32),
        grid=(b_pad // tb,),
        in_specs=[
            pl.BlockSpec((tb, dim_obs), lambda i: (i, 0)),        # stream x tiles
            resident(w1), resident(b1),
            resident(w2), resident(b2),
            resident(wo_row),
            pl.BlockSpec(memory_space=pltpu.MemorySpace.SMEM),    # bo scalar
        ],
        out_specs=pl.BlockSpec((1, tb), lambda i: (0, i)),
        compiler_params=pltpu.CompilerParams(
            dimension_semantics=("parallel",),  # megacore-shard batch tiles (v7x)
        ),
    )(x, w1, b1, w2, b2, wo_row, bo)

    return out[0, :B][:, None]                 # back to (B, 1)


def xavier_uniform(key, fan_in, fan_out, dtype=jnp.float32):
    # torch.nn.init.xavier_uniform_ : U(-a, a), a = sqrt(6 / (fan_in + fan_out))
    bound = (6.0 / (fan_in + fan_out)) ** 0.5
    # Stored as [in, out] (pre-transposed w.r.t. PyTorch's [out, in]).
    return jax.random.uniform(key, (fan_in, fan_out), dtype, -bound, bound)


def init_params(key, dim_obs, dims_hidden=(64, 64)):
    h1, h2 = dims_hidden
    k1, k2, k3 = jax.random.split(key, 3)
    return {
        "w1": xavier_uniform(k1, dim_obs, h1),
        "b1": jnp.zeros((1, h1), jnp.float32),
        "w2": xavier_uniform(k2, h1, h2),
        "b2": jnp.zeros((1, h2), jnp.float32),
        "wo": xavier_uniform(k3, h2, 1),
        "bo": jnp.zeros((1, 1), jnp.float32),
    }


def critic_ref(x, params):
    """Pure-JAX reference for correctness checking."""
    h1 = jnp.tanh(x @ params["w1"] + params["b1"])
    h2 = jnp.tanh(h1 @ params["w2"] + params["b2"])
    return h2 @ params["wo"] + params["bo"]


if __name__ == "__main__":
    key = jax.random.PRNGKey(0)
    k_obs, k_obs2, k_params = jax.random.split(key, 3)

    # Small, forward-consistent shapes: batch=8 observations of dim_obs=16,
    # hidden dims (32, 32) (same structure as the default (64, 64)).
    batch, dim_obs = 8, 16
    dims_hidden = (32, 32)

    x = jax.random.normal(k_obs, (batch, dim_obs), jnp.float32)
    params = init_params(k_params, dim_obs, dims_hidden)

    out = jax.block_until_ready(critic_forward(x, params))
    ref = critic_ref(x, params)
    assert out.shape == (batch, 1)
    assert jnp.allclose(out, ref, atol=1e-5, rtol=1e-5)

    # Multi-tile path: batch not divisible by the tile -> padding + several
    # pipelined grid steps with resident weights.
    batch2 = 300
    x2 = jax.random.normal(k_obs2, (batch2, dim_obs), jnp.float32)
    out2 = jax.block_until_ready(critic_forward(x2, params, block_b=128))
    ref2 = critic_ref(x2, params)
    assert out2.shape == (batch2, 1)
    assert jnp.allclose(out2, ref2, atol=1e-5, rtol=1e-5)

    print("KERNEL_OK")
</pallas_src>

<mosaic_0001>
module attributes {stable_mosaic.version = 11 : i64} {
  func.func @critic_kernel(%arg0: i32, %arg1: memref<128x16xf32, #tpu.memory_space<vmem>>, %arg2: memref<16x32xf32, #tpu.memory_space<vmem>>, %arg3: memref<1x32xf32, #tpu.memory_space<vmem>>, %arg4: memref<32x32xf32, #tpu.memory_space<vmem>>, %arg5: memref<1x32xf32, #tpu.memory_space<vmem>>, %arg6: memref<1x32xf32, #tpu.memory_space<vmem>>, %arg7: memref<1xf32, #tpu.memory_space<smem>>, %arg8: memref<1x128xf32, #tpu.memory_space<vmem>>) attributes {dimension_semantics = [#tpu.dimension_semantics<parallel>], iteration_bounds = array<i64: 1>, scalar_prefetch = 0 : i64, scratch_operands = 0 : i64, tpu.core_type = #tpu.core_type<tc>, window_params = [{transform_indices = @transform_0, window_bounds = array<i64: 128, 16>}, {pipeline_mode = #tpu.pipeline_mode<synchronous>, transform_indices = @transform_1, window_bounds = array<i64: 16, 32>}, {pipeline_mode = #tpu.pipeline_mode<synchronous>, transform_indices = @transform_2, window_bounds = array<i64: 1, 32>}, {pipeline_mode = #tpu.pipeline_mode<synchronous>, transform_indices = @transform_3, window_bounds = array<i64: 32, 32>}, {pipeline_mode = #tpu.pipeline_mode<synchronous>, transform_indices = @transform_4, window_bounds = array<i64: 1, 32>}, {pipeline_mode = #tpu.pipeline_mode<synchronous>, transform_indices = @transform_5, window_bounds = array<i64: 1, 32>}, {transform_indices = @transform_6, window_bounds = array<i64: 1>}, {transform_indices = @transform_7, window_bounds = array<i64: 1, 128>}]} {
    %c0 = arith.constant 0 : index
    %c0_0 = arith.constant 0 : index
    %0 = vector.load %arg1[%c0, %c0_0] : memref<128x16xf32, #tpu.memory_space<vmem>>, vector<128x16xf32>
    %c0_1 = arith.constant 0 : index
    %c0_2 = arith.constant 0 : index
    %1 = vector.load %arg2[%c0_1, %c0_2] : memref<16x32xf32, #tpu.memory_space<vmem>>, vector<16x32xf32>
    %cst = arith.constant dense<0.000000e+00> : vector<128x32xf32>
    %2 = tpu.matmul %0, %1, %cst {dimension_numbers = #tpu.dot_dimension_numbers<[1], [0], [0], [1], [0, 0, 1, 1], [], []>} : vector<128x16xf32>, vector<16x32xf32>, vector<128x32xf32> -> vector<128x32xf32>
    %c0_3 = arith.constant 0 : index
    %c0_4 = arith.constant 0 : index
    %3 = vector.load %arg3[%c0_3, %c0_4] : memref<1x32xf32, #tpu.memory_space<vmem>>, vector<1x32xf32>
    %4 = vector.broadcast %3 : vector<1x32xf32> to vector<128x32xf32>
    %5 = arith.addf %2, %4 : vector<128x32xf32>
    %6 = math.tanh %5 : vector<128x32xf32>
    %c0_5 = arith.constant 0 : index
    %c0_6 = arith.constant 0 : index
    %7 = vector.load %arg4[%c0_5, %c0_6] : memref<32x32xf32, #tpu.memory_space<vmem>>, vector<32x32xf32>
    %cst_7 = arith.constant dense<0.000000e+00> : vector<128x32xf32>
    %8 = tpu.matmul %6, %7, %cst_7 {dimension_numbers = #tpu.dot_dimension_numbers<[1], [0], [0], [1], [0, 0, 1, 1], [], []>} : vector<128x32xf32>, vector<32x32xf32>, vector<128x32xf32> -> vector<128x32xf32>
    %c0_8 = arith.constant 0 : index
    %c0_9 = arith.constant 0 : index
    %9 = vector.load %arg5[%c0_8, %c0_9] : memref<1x32xf32, #tpu.memory_space<vmem>>, vector<1x32xf32>
    %10 = vector.broadcast %9 : vector<1x32xf32> to vector<128x32xf32>
    %11 = arith.addf %8, %10 : vector<128x32xf32>
    %12 = math.tanh %11 : vector<128x32xf32>
    %c0_10 = arith.constant 0 : index
    %c0_11 = arith.constant 0 : index
    %13 = vector.load %arg6[%c0_10, %c0_11] : memref<1x32xf32, #tpu.memory_space<vmem>>, vector<1x32xf32>
    %14 = vector.broadcast %13 : vector<1x32xf32> to vector<128x32xf32>
    %15 = arith.mulf %12, %14 : vector<128x32xf32>
    %cst_12 = arith.constant dense<0.000000e+00> : vector<128xf32>
    %16 = vector.multi_reduction <add>, %15, %cst_12 [1] : vector<128x32xf32> to vector<128xf32>
    %c0_13 = arith.constant 0 : index
    %17 = memref.load %arg7[%c0_13] : memref<1xf32, #tpu.memory_space<smem>>
    %18 = vector.broadcast %17 : f32 to vector<128xf32>
    %19 = arith.addf %16, %18 : vector<128xf32>
    %c0_14 = arith.constant 0 : index
    %c0_15 = arith.constant 0 : index
    %20 = vector.load %arg8[%c0_14, %c0_15] : memref<1x128xf32, #tpu.memory_space<vmem>>, vector<1x128xf32>
    %21 = vector.shape_cast %20 : vector<1x128xf32> to vector<128xf32>
    %22 = vector.shape_cast %19 : vector<128xf32> to vector<1x128xf32>
    tpu.vector_store %arg8[%c0_14, %c0_15], %22 {strides = array<i32>} : memref<1x128xf32, #tpu.memory_space<vmem>>, vector<1x128xf32>,
    return
  }
  func.func @transform_0(%arg0: i32) -> (i32, i32) {
    %c0_i32 = arith.constant 0 : i32
    %c0_i32_0 = arith.constant 0 : i32
    return %arg0, %c0_i32 : i32, i32
  }
  func.func @transform_1(%arg0: i32) -> (i32, i32) {
    %c0_i32 = arith.constant 0 : i32
    %c0_i32_0 = arith.constant 0 : i32
    %c0_i32_1 = arith.constant 0 : i32
    return %c0_i32, %c0_i32_0 : i32, i32
  }
  func.func @transform_2(%arg0: i32) -> (i32, i32) {
    %c0_i32 = arith.constant 0 : i32
    %c0_i32_0 = arith.constant 0 : i32
    %c0_i32_1 = arith.constant 0 : i32
    return %c0_i32, %c0_i32_0 : i32, i32
  }
  func.func @transform_3(%arg0: i32) -> (i32, i32) {
    %c0_i32 = arith.constant 0 : i32
    %c0_i32_0 = arith.constant 0 : i32
    %c0_i32_1 = arith.constant 0 : i32
    return %c0_i32, %c0_i32_0 : i32, i32
  }
  func.func @transform_4(%arg0: i32) -> (i32, i32) {
    %c0_i32 = arith.constant 0 : i32
    %c0_i32_0 = arith.constant 0 : i32
    %c0_i32_1 = arith.constant 0 : i32
    return %c0_i32, %c0_i32_0 : i32, i32
  }
  func.func @transform_5(%arg0: i32) -> (i32, i32) {
    %c0_i32 = arith.constant 0 : i32
    %c0_i32_0 = arith.constant 0 : i32
    %c0_i32_1 = arith.constant 0 : i32
    return %c0_i32, %c0_i32_0 : i32, i32
  }
  func.func @transform_6(%arg0: i32) -> i32 {
    %c0_i32 = arith.constant 0 : i32
    %c0_i32_0 = arith.constant 0 : i32
    return %c0_i32 : i32
  }
  func.func @transform_7(%arg0: i32) -> (i32, i32) {
    %c0_i32 = arith.constant 0 : i32
    %c0_i32_0 = arith.constant 0 : i32
    return %c0_i32, %arg0 : i32, i32
  }
}

</mosaic_0001>

<bundles_post_ra>
// kernel: tpu_custom_call.1
= control target key start
LH: loop header
LB: loop body
LE: loop exit
PB: predicated region body
PF: predicated region fallthrough
CT: control target
= control target key end

     0   :  { %vm53_vm0 = vcmask 130048   ;;  %s1238_s0 = inlined_call_operand.vmem [shape: f32[128,16], index: 0, kind: input, shape index: {}]   ;;  %s1239_s1 = inlined_call_operand.vmem [shape: f32[16,32], index: 1, kind: input, shape index: {}]   ;;  %s1240_s2 = inlined_call_operand.vmem [shape: f32[1,32], index: 2, kind: input, shape index: {}]   ;;  %s1241_s3 = inlined_call_operand.vmem [shape: f32[32,32], index: 3, kind: input, shape index: {}]   ;;  %s1242_s4 = inlined_call_operand.vmem [shape: f32[1,32], index: 4, kind: input, shape index: {}]   ;;  %s1243_s5 = inlined_call_operand.vmem [shape: f32[1,32], index: 5, kind: input, shape index: {}]   ;;  %s1244_s6 = inlined_call_operand.<no memory space> [shape: f32[1], index: 6, kind: input, shape index: {}]   ;;  %s1245_s7 = inlined_call_operand.hbm [shape: f32[1,128], index: 7, kind: output, shape index: {}]  }
   0x1   :  { %v44_v0 = vld [vmem:[%s1239_s1] sm:$0xff]  ;;  %v45_v1 = vld [vmem:[%s1239_s1 + $0x8] sm:$0xff]  ;;  %v30_v5 = vld [vmem:[%s1238_s0 + $0x10] sm:$0xff] }
   0x2   :  { %v28_v2 = vld [vmem:[%s1238_s0] sm:$0xff]  ;;  %v849_v3 = vpack.c.bf16 %v45_v1, %v44_v0  ;;  %v29_v4 = vld [vmem:[%s1238_s0 + $0x8] sm:$0xff] }
   0x3   :  { %793 = vmatprep.mubr.msk.f32.mxu0 %vm53_vm0, %v28_v2 }
   0x4   :  { %850 = vmatprep.subr.bf16.mxu0 %v849_v3 }
   0x5   :  { %852 = vmatpush3.bf16.msra.mxu0 %v849_v3 }
   0x6   :  { %13 = vsyncpa [#allocation4], 0  ;;  %v31_v6 = vld [vmem:[%s1238_s0 + $0x18] sm:$0xff]  ;;  %v32_v7 = vld [vmem:[%s1238_s0 + $0x20] sm:$0xff]  ;;  %vm274_vm1 = vcmask 261120   ;;  %vm600_vm2 = vcmask 130112  }
   0x7   :  { %v33_v8 = vld [vmem:[%s1238_s0 + $0x28] sm:$0xff]  ;;  %v34_v9 = vld [vmem:[%s1238_s0 + $0x30] sm:$0xff]  ;;  %v35_v10 = vld [vmem:[%s1238_s0 + $0x38] sm:$0xff]  ;;  %vm607_vm3 = vcmask 195712   ;;  %vm614_vm4 = vcmask 261312   ;;  %vm621_vm5 = vcmask 326912  }
   0x8   :  { %794 = vmatmul.mubr.msk.f32.vlgmr.msra.gmra.mrb[0].mxu0 %vm53_vm0, %v29_v4  ;;  %v36_v11 = vld [vmem:[%s1238_s0 + $0x40] sm:$0xff]  ;;  %v37_v12 = vld [vmem:[%s1238_s0 + $0x48] sm:$0xff]  ;;  %v38_v13 = vld [vmem:[%s1238_s0 + $0x50] sm:$0xff]  ;;  %vm628_vm6 = vcmask 392512   ;;  %vm635_vm7 = vcmask 458112   ;;  %vm642_vm8 = vcmask 523712  }
   0x9   :  { %796 = vmatprep.mubr.msk.f32.mxu0 %vm53_vm0, %v30_v5  ;;  %v39_v14 = vld [vmem:[%s1238_s0 + $0x58] sm:$0xff]  ;;  %v40_v15 = vld [vmem:[%s1238_s0 + $0x60] sm:$0xff]  ;;  %v41_v16 = vld [vmem:[%s1238_s0 + $0x68] sm:$0xff]  ;;  %vm649_vm9 = vcmask 589312   ;;  %vm656_vm10 = vcmask 654912   ;;  %vm663_vm11 = vcmask 720512  }
   0xa   :  { %v42_v17 = vld [vmem:[%s1238_s0 + $0x70] sm:$0xff]  ;;  %v43_v18 = vld [vmem:[%s1238_s0 + $0x78] sm:$0xff]  ;;  %v263_v19 = vld [vmem:[%s1241_s3] sm:$0xff]  ;;  %vm670_vm12 = vcmask 786112   ;;  %vm677_vm13 = vcmask 851712   ;;  %vm684_vm14 = vcmask 917312  }
   0xb   :  { %v264_v20 = vld [vmem:[%s1241_s3 + $0x8] sm:$0xff]  ;;  %v265_v22 = vld [vmem:[%s1241_s3 + $0x10] sm:$0xff]  ;;  %v266_v23 = vld [vmem:[%s1241_s3 + $0x18] sm:$0xff]  ;;  %vm691_vm15 = vcmask 982912  }
   0xc   :  { %797 = vmatmul.mubr.msk.f32.gmra.mrb[2].mxu0 %vm53_vm0, %v31_v6  ;;  %v853_v21 = vpack.c.bf16 %v264_v20, %v263_v19  ;;  %v857_v24 = vpack.c.bf16 %v266_v23, %v265_v22  ;;  %v1076_v25 = vld [vmem:[%s1240_s2] ss:$0 sm:$0xff] }
   0xd   :  { %799 = vmatprep.mubr.msk.f32.mxu0 %vm53_vm0, %v32_v7  ;;  %v1124_v23 = vld [vmem:[%s1243_s5] ss:$0 sm:$0xff] }
   0xe   :  { %854 = vmatprep.subr.bf16.mxu1 %v853_v21 }
   0xf   :  { %856 = vmatpush3.bf16.msra.mxu1 %v853_v21 }
  0x10   :  { %800 = vmatmul.mubr.msk.f32.gmra.mrb[4].mxu0 %vm53_vm0, %v33_v8  ;;  %858 = vmatprep.subr.bf16.mxu1 %v857_v24 }
  0x11   :  { %802 = vmatprep.mubr.msk.f32.mxu0 %vm53_vm0, %v34_v9 }
  0x13   :  { %860 = vmatpush3.bf16.msra.mxu1 %v857_v24 }
  0x14   :  { %803 = vmatmul.mubr.msk.f32.gmra.mrb[6].mxu0 %vm53_vm0, %v35_v10  ;;  %v1113_v10 = vld [vmem:[%s1242_s4] ss:$0 sm:$0xff] }
  0x15   :  { %805 = vmatprep.mubr.msk.f32.mxu0 %vm53_vm0, %v36_v11 }
  0x18   :  { %806 = vmatmul.mubr.msk.f32.gmra.mrb[8].mxu0 %vm53_vm0, %v37_v12 }
  0x19   :  { %808 = vmatprep.mubr.msk.f32.mxu0 %vm53_vm0, %v38_v13 }
  0x1c   :  { %809 = vmatmul.mubr.msk.f32.gmra.mrb[10].mxu0 %vm53_vm0, %v39_v14 }
  0x1d   :  { %811 = vmatprep.mubr.msk.f32.mxu0 %vm53_vm0, %v40_v15 }
  0x20   :  { %812 = vmatmul.mubr.msk.f32.gmra.mrb[12].mxu0 %vm53_vm0, %v41_v16 }
  0x21   :  { %814 = vmatprep.mubr.msk.f32.mxu0 %vm53_vm0, %v42_v17 }
  0x24   :  { %815 = vmatmul.mubr.msk.f32.gmra.mrb[14].mxu0 %vm53_vm0, %v43_v18  ;;  %vm698_vm0 = vcmask 1048512  }
  0xdb   :  { %v795_v26 = vpop.f32.mrb[0].mxu0 }
  0xdc   :  { %v174_v27 = vadd.f32 %v795_v26, %v1076_v25  ;;  %v168_v28 = vpop.f32.mrb[1].mxu0 }
  0xdd   :  { %v169_v29 = vadd.f32 %v1076_v25, %v168_v28 }
  0xdf   :  { %862 = vtanh.f32 %v169_v29  ;;  %v798_v30 = vpop.f32.mrb[2].mxu0 }
  0xe0   :  { %864 = vtanh.f32 %v174_v27  ;;  %v184_v31 = vadd.f32 %v798_v30, %v1076_v25  ;;  %v178_v32 = vpop.f32.mrb[3].mxu0 }
  0xe1   :  { %v179_v33 = vadd.f32 %v1076_v25, %v178_v32 }
  0xe3   :  { %866 = vtanh.f32 %v179_v33  ;;  %v801_v34 = vpop.f32.mrb[4].mxu0 }
  0xe4   :  { %868 = vtanh.f32 %v184_v31  ;;  %v194_v35 = vadd.f32 %v801_v34, %v1076_v25  ;;  %v188_v36 = vpop.f32.mrb[5].mxu0 }
  0xe5   :  { %v189_v37 = vadd.f32 %v1076_v25, %v188_v36 }
  0xe6   :  { %870 = vtanh.f32 %v194_v35 }
  0xe7   :  { %872 = vtanh.f32 %v189_v37  ;;  %v804_v38 = vpop.f32.mrb[6].mxu0 }
  0xe8   :  { %v204_v39 = vadd.f32 %v804_v38, %v1076_v25  ;;  %v198_v40 = vpop.f32.mrb[7].mxu0 }
  0xe9   :  { %v863_v41 = vpop.eup %862  ;;  %v199_v42 = vadd.f32 %v1076_v25, %v198_v40 }
  0xea   :  { %v865_v43 = vpop.eup %864  ;;  %874 = vtanh.f32 %v204_v39  ;;  %825 = vmatprep.mubr.msk.f32.mxu1 %vm274_vm1, %v863_v41 }
  0xeb   :  { %876 = vtanh.f32 %v199_v42  ;;  %v807_v44 = vpop.f32.mrb[8].mxu0  ;;  %826 = vmatmul.mubr.msk.f32.vlgmr.msra.gmra.mrb[0].mxu1 %vm274_vm1, %v865_v43 }
  0xec   :  { %v214_v45 = vadd.f32 %v807_v44, %v1076_v25  ;;  %v208_v46 = vpop.f32.mrb[9].mxu0 }
  0xed   :  { %v867_v47 = vpop.eup %866  ;;  %v209_v48 = vadd.f32 %v1076_v25, %v208_v46 }
  0xee   :  { %v869_v49 = vpop.eup %868  ;;  %878 = vtanh.f32 %v214_v45  ;;  %828 = vmatprep.mubr.msk.f32.mxu1 %vm274_vm1, %v867_v47 }
  0xef   :  { %880 = vtanh.f32 %v209_v48  ;;  %v810_v50 = vpop.f32.mrb[10].mxu0  ;;  %829 = vmatmul.mubr.msk.f32.gmra.mrb[2].mxu1 %vm274_vm1, %v869_v49 }
  0xf0   :  { %v871_v51 = vpop.eup %870  ;;  %v224_v52 = vadd.f32 %v810_v50, %v1076_v25  ;;  %v218_v53 = vpop.f32.mrb[11].mxu0 }
  0xf1   :  { %v873_v54 = vpop.eup %872  ;;  %v219_v55 = vadd.f32 %v1076_v25, %v218_v53 }
  0xf2   :  { %882 = vtanh.f32 %v224_v52  ;;  %831 = vmatprep.mubr.msk.f32.mxu1 %vm274_vm1, %v873_v54 }
  0xf3   :  { %884 = vtanh.f32 %v219_v55  ;;  %v813_v56 = vpop.f32.mrb[12].mxu0  ;;  %832 = vmatmul.mubr.msk.f32.gmra.mrb[4].mxu1 %vm274_vm1, %v871_v51 }
  0xf4   :  { %v875_v57 = vpop.eup %874  ;;  %v234_v58 = vadd.f32 %v813_v56, %v1076_v25  ;;  %v228_v59 = vpop.f32.mrb[13].mxu0 }
  0xf5   :  { %v877_v60 = vpop.eup %876  ;;  %v229_v61 = vadd.f32 %v1076_v25, %v228_v59 }
  0xf6   :  { %886 = vtanh.f32 %v234_v58  ;;  %834 = vmatprep.mubr.msk.f32.mxu1 %vm274_vm1, %v877_v60 }
  0xf7   :  { %888 = vtanh.f32 %v229_v61  ;;  %v816_v62 = vpop.f32.mrb[14].mxu0  ;;  %835 = vmatmul.mubr.msk.f32.gmra.mrb[6].mxu1 %vm274_vm1, %v875_v57 }
  0xf8   :  { %v879_v63 = vpop.eup %878  ;;  %v244_v0 = vadd.f32 %v816_v62, %v1076_v25  ;;  %v238_v1 = vpop.f32.mrb[15].mxu0 }
  0xf9   :  { %v881_v2 = vpop.eup %880  ;;  %v239_v3 = vadd.f32 %v1076_v25, %v238_v1 }
  0xfa   :  { %890 = vtanh.f32 %v244_v0  ;;  %837 = vmatprep.mubr.msk.f32.mxu1 %vm274_vm1, %v881_v2 }
  0xfb   :  { %892 = vtanh.f32 %v239_v3  ;;  %838 = vmatmul.mubr.msk.f32.gmra.mrb[8].mxu1 %vm274_vm1, %v879_v63 }
  0xfc   :  { %v883_v4 = vpop.eup %882 }
  0xfd   :  { %v885_v5 = vpop.eup %884 }
  0xfe   :  { %840 = vmatprep.mubr.msk.f32.mxu1 %vm274_vm1, %v885_v5 }
  0xff   :  { %841 = vmatmul.mubr.msk.f32.gmra.mrb[10].mxu1 %vm274_vm1, %v883_v4 }
 0x100   :  { %v887_v6 = vpop.eup %886 }
 0x101   :  { %v889_v7 = vpop.eup %888 }
 0x102   :  { %843 = vmatprep.mubr.msk.f32.mxu1 %vm274_vm1, %v889_v7 }
 0x103   :  { %844 = vmatmul.mubr.msk.f32.gmra.mrb[12].mxu1 %vm274_vm1, %v887_v6 }
 0x104   :  { %v891_v8 = vpop.eup %890 }
 0x105   :  { %v893_v9 = vpop.eup %892 }
 0x106   :  { %846 = vmatprep.mubr.msk.f32.mxu1 %vm274_vm1, %v893_v9 }
 0x107   :  { %847 = vmatmul.mubr.msk.f32.gmra.mrb[14].mxu1 %vm274_vm1, %v891_v8 }
 0x1be   :  { %v827_v11 = vpop.f32.mrb[0].mxu1 }
 0x1bf   :  { %v395_v12 = vadd.f32 %v827_v11, %v1113_v10  ;;  %v389_v13 = vpop.f32.mrb[1].mxu1 }
 0x1c0   :  { %v390_v14 = vadd.f32 %v1113_v10, %v389_v13 }
 0x1c1   :  { %894 = vtanh.f32 %v395_v12 }
 0x1c2   :  { %896 = vtanh.f32 %v390_v14  ;;  %v830_v15 = vpop.f32.mrb[2].mxu1 }
 0x1c3   :  { %v405_v16 = vadd.f32 %v830_v15, %v1113_v10  ;;  %v399_v17 = vpop.f32.mrb[3].mxu1 }
 0x1c4   :  { %v400_v18 = vadd.f32 %v1113_v10, %v399_v17 }
 0x1c5   :  { %898 = vtanh.f32 %v405_v16 }
 0x1c6   :  { %900 = vtanh.f32 %v400_v18  ;;  %v833_v19 = vpop.f32.mrb[4].mxu1 }
 0x1c7   :  { %v415_v20 = vadd.f32 %v833_v19, %v1113_v10  ;;  %v409_v21 = vpop.f32.mrb[5].mxu1 }
 0x1c8   :  { %v410_v22 = vadd.f32 %v1113_v10, %v409_v21 }
 0x1c9   :  { %902 = vtanh.f32 %v415_v20 }
 0x1ca   :  { %904 = vtanh.f32 %v410_v22  ;;  %v836_v24 = vpop.f32.mrb[6].mxu1 }
 0x1cb   :  { %v895_v25 = vpop.eup %894  ;;  %v425_v26 = vadd.f32 %v836_v24, %v1113_v10  ;;  %v419_v27 = vpop.f32.mrb[7].mxu1 }
 0x1cc   :  { %v897_v28 = vpop.eup %896  ;;  %v420_v29 = vadd.f32 %v1113_v10, %v419_v27  ;;  %v492_v30 = vmul.f32 %v895_v25, %v1124_v23 }
 0x1cd   :  { %906 = vtanh.f32 %v425_v26  ;;  %v491_v33 = vmul.f32 %v897_v28, %v1124_v23 }
 0x1ce   :  { %908 = vtanh.f32 %v420_v29  ;;  %v839_v31 = vpop.f32.mrb[8].mxu1  ;;  %v510_v32 = vsel %vm274_vm1, %v492_v30, 0.0  ;;  %v589_v29 = vlaneseq }
 0x1cf   :  { %v899_v34 = vpop.eup %898  ;;  %v435_v35 = vadd.f32 %v839_v31, %v1113_v10  ;;  %511 = vadd.xlane.f32.xlu0 %v510_v32  ;;  %v429_v36 = vpop.f32.mrb[9].mxu1  ;;  %v507_v42 = vsel %vm274_vm1, %v491_v33, 0.0 }
 0x1d0   :  { %v901_v37 = vpop.eup %900  ;;  %v430_v38 = vadd.f32 %v1113_v10, %v429_v36  ;;  %v494_v39 = vmul.f32 %v899_v34, %v1124_v23  ;;  %v1168_v30 = vand.u32 127, %v589_v29  ;;  %v1170_v32 = vshrl.u32 %v589_v29, 7 }
 0x1d1   :  { %910 = vtanh.f32 %v435_v35  ;;  %v493_v43 = vmul.f32 %v901_v37, %v1124_v23  ;;  %v1176_v34 = vstv %s1244_s6  ;;  %s950_s6 = smov [#allocation3]  }
 0x1d2   :  { %912 = vtanh.f32 %v430_v38  ;;  %v842_v40 = vpop.f32.mrb[10].mxu1  ;;  %v516_v41 = vsel %vm274_vm1, %v494_v39, 0.0  ;;  %v595_v33 = vadd.s32 4294967288, %v1168_v30  ;;  %v609_v35 = vadd.s32 4294967272, %v1168_v30  ;;  %s708_s23 = sshll.u32 %s950_s6, 4  ;;  %s709_s23 = int_to_ptr.vmem [resolvable:$true] %s708_s23 }
 0x1d3   :  { %v903_v44 = vpop.eup %902  ;;  %v445_v45 = vadd.f32 %v842_v40, %v1113_v10  ;;  %517 = vadd.xlane.f32.xlu1 %v516_v41  ;;  %v439_v46 = vpop.f32.mrb[11].mxu1  ;;  %508 = vadd.xlane.f32.xlu0 %v507_v42  ;;  %v513_v51 = vsel %vm274_vm1, %v493_v43, 0.0  ;;  %v593_v37 = vsub.s32 %v1168_v30, %v1170_v32  ;;  %v616_v39 = vadd.s32 4294967264, %v1168_v30  ;;  %s926_s24 = scalar_lea.vmem %s709_s23, 16  ;;  %s930_s25 = scalar_lea.vmem %s709_s23, 32 }
 0x1d4   :  { %v905_v47 = vpop.eup %904  ;;  %v440_v48 = vadd.f32 %v1113_v10, %v439_v46  ;;  %v496_v52 = vmul.f32 %v903_v44, %v1124_v23  ;;  %v598_v41 = vsub.s32 %v595_v33, %v1170_v32  ;;  %v623_v43 = vadd.s32 4294967256, %v1168_v30  ;;  %p927_p0 = scmp.ne.s32.totalorder %s709_s23, %s926_s24  ;;  %p931_p1 = scmp.lt.s32.totalorder %s709_s23, %s709_s23 }
 0x1d5   :  { %914 = vtanh.f32 %v445_v45  ;;  %v495_v49 = vmul.f32 %v905_v47, %v1124_v23  ;;  %v630_v45 = vadd.s32 4294967248, %v1168_v30  ;;  %v612_v46 = vsub.s32 %v609_v35, %v1170_v32  ;;  %p932_p2 = scmp.lt.s32.totalorder %s930_s25, %s926_s24 }
 0x1d6   :  { %916 = vtanh.f32 %v440_v48  ;;  %v845_v50 = vpop.f32.mrb[12].mxu1  ;;  %v522_v61 = vsel %vm274_vm1, %v496_v52, 0.0 }
 0x1d7   :  { %v907_v53 = vpop.eup %906  ;;  %v455_v54 = vadd.f32 %v845_v50, %v1113_v10  ;;  %v449_v55 = vpop.f32.mrb[13].mxu1  ;;  %514 = vadd.xlane.f32.xlu1 %v513_v51  ;;  %v519_v56 = vsel %vm274_vm1, %v495_v49, 0.0  ;;  %v619_v50 = vsub.s32 %v616_v39, %v1170_v32  ;;  %v686_v39 = vadd.s32 4294967184, %v1168_v30  ;;  %p933_p3 = por %p932_p2, %p931_p1 }
 0x1d8   :  { %v909_v57 = vpop.eup %908  ;;  %v450_v58 = vadd.f32 %v1113_v10, %v449_v55  ;;  %520 = vadd.xlane.f32.xlu0 %v519_v56  ;;  %v498_v62 = vmul.f32 %v907_v53, %v1124_v23  ;;  %v626_v55 = vsub.s32 %v623_v43, %v1170_v32 }
 0x1d9   :  { %918 = vtanh.f32 %v455_v54  ;;  %v497_v59 = vmul.f32 %v909_v57, %v1124_v23  ;;  %v633_v57 = vsub.s32 %v630_v45, %v1170_v32  ;;  %p934_p4 = pnand %p933_p3, %p927_p0 }
 0x1da   :  { %920 = vtanh.f32 %v450_v58  ;;  %v848_v60 = vpop.f32.mrb[14].mxu1  ;;  %v528_v6 = vsel %vm274_vm1, %v498_v62, 0.0  ;;  %v637_v58 = vadd.s32 4294967240, %v1168_v30 }
 0x1db   :  { %v911_v63 = vpop.eup %910  ;;  %v465_v0 = vadd.f32 %v848_v60, %v1113_v10  ;;  %v459_v1 = vpop.f32.mrb[15].mxu1  ;;  %523 = vadd.xlane.f32.xlu1 %v522_v61  ;;  %v525_v2 = vsel %vm274_vm1, %v497_v59, 0.0 }
 0x1dc   :  { %v913_v3 = vpop.eup %912  ;;  %v460_v4 = vadd.f32 %v1113_v10, %v459_v1  ;;  %526 = vadd.xlane.f32.xlu0 %v525_v2  ;;  %v500_v7 = vmul.f32 %v911_v63, %v1124_v23  ;;  %v644_v63 = vadd.s32 4294967232, %v1168_v30 }
 0x1dd   :  { %922 = vtanh.f32 %v465_v0  ;;  %v499_v5 = vmul.f32 %v913_v3, %v1124_v23 }
 0x1de   :  { %924 = vtanh.f32 %v460_v4  ;;  %v534_v13 = vsel %vm274_vm1, %v500_v7, 0.0  ;;  %v640_v7 = vsub.s32 %v637_v58, %v1170_v32 }
 0x1df   :  { %v915_v8 = vpop.eup %914  ;;  %529 = vadd.xlane.f32.xlu1 %v528_v6  ;;  %v531_v9 = vsel %vm274_vm1, %v499_v5, 0.0 }
 0x1e0   :  { %v917_v11 = vpop.eup %916  ;;  %532 = vadd.xlane.f32.xlu0 %v531_v9  ;;  %v502_v10 = vmul.f32 %v915_v8, %v1124_v23  ;;  %v651_v8 = vadd.s32 4294967224, %v1168_v30 }
 0x1e1   :  { %v501_v12 = vmul.f32 %v917_v11, %v1124_v23 }
 0x1e2   :  { %v540_v18 = vsel %vm274_vm1, %v502_v10, 0.0 }
 0x1e3   :  { %v919_v14 = vpop.eup %918  ;;  %535 = vadd.xlane.f32.xlu1 %v534_v13  ;;  %v537_v15 = vsel %vm274_vm1, %v501_v12, 0.0  ;;  %v647_v12 = vsub.s32 %v644_v63, %v1170_v32  ;;  %v658_v13 = vadd.s32 4294967216, %v1168_v30 }
 0x1e4   :  { %v921_v16 = vpop.eup %920  ;;  %538 = vadd.xlane.f32.xlu0 %v537_v15  ;;  %v504_v19 = vmul.f32 %v919_v14, %v1124_v23 }
 0x1e5   :  { %v503_v17 = vmul.f32 %v921_v16, %v1124_v23 }
 0x1e6   :  { %v546_v25 = vsel %vm274_vm1, %v504_v19, 0.0  ;;  %v665_v19 = vadd.s32 4294967208, %v1168_v30 }
 0x1e7   :  { %v923_v20 = vpop.eup %922  ;;  %541 = vadd.xlane.f32.xlu1 %v540_v18  ;;  %v543_v21 = vsel %vm274_vm1, %v503_v17, 0.0  ;;  %v654_v18 = vsub.s32 %v651_v8, %v1170_v32 }
 0x1e8   :  { %v925_v22 = vpop.eup %924  ;;  %544 = vadd.xlane.f32.xlu0 %v543_v21  ;;  %v506_v26 = vmul.f32 %v923_v20, %v1124_v23  ;;  %v668_v33 = vsub.s32 %v665_v19, %v1170_v32 }
 0x1e9   :  { %v505_v24 = vmul.f32 %v925_v22, %v1124_v23  ;;  %v602_v23 = vadd.s32 4294967280, %v1168_v30 }
 0x1ea   :  { %v552_v28 = vsel %vm274_vm1, %v506_v26, 0.0 }
 0x1eb   :  { %547 = vadd.xlane.f32.xlu1 %v546_v25  ;;  %v549_v27 = vsel %vm274_vm1, %v505_v24, 0.0  ;;  %v605_v44 = vsub.s32 %v602_v23, %v1170_v32  ;;  %v661_v24 = vsub.s32 %v658_v13, %v1170_v32  ;;  %v672_v25 = vadd.s32 4294967200, %v1168_v30 }
 0x1ec   :  { %550 = vadd.xlane.f32.xlu0 %v549_v27  ;;  %v679_v23 = vadd.s32 4294967192, %v1168_v30 }
 0x1ee   :  { %v682_v45 = vsub.s32 %v679_v23, %v1170_v32 }
 0x1ef   :  { %553 = vadd.xlane.f32.xlu1 %v552_v28 }
 0x25c   :  { %v512_v31 = vpop.xlane.xlu0 %511 }
 0x25d   :  { %v558_v42 = vadd.f32 %v1176_v34, %v512_v31 }
 0x25f   :  { %v599_v53 = vrot.slane %v558_v42, %v598_v41 }
 0x260   :  { %v518_v36 = vpop.xlane.xlu1 %517  ;;  %v509_v38 = vpop.xlane.xlu0 %508 }
 0x261   :  { %v557_v40 = vadd.f32 %v1176_v34, %v509_v38  ;;  %v560_v47 = vadd.f32 %v1176_v34, %v518_v36  ;;  %v675_v38 = vsub.s32 %v672_v25, %v1170_v32 }
 0x263   :  { %v594_v48 = vrot.slane %v557_v40, %v593_v37  ;;  %v613_v59 = vrot.slane %v560_v47, %v612_v46  ;;  %v693_v46 = vadd.s32 4294967176, %v1168_v30 }
 0x264   :  { %v515_v49 = vpop.xlane.xlu1 %514 }
 0x265   :  { %v559_v51 = vadd.f32 %v1176_v34, %v515_v49  ;;  %v521_v52 = vpop.xlane.xlu0 %520  ;;  %v601_v60 = vsel %vm600_vm2, %v599_v53, %v594_v48 }
 0x266   :  { %v561_v54 = vadd.f32 %v1176_v34, %v521_v52 }
 0x267   :  { %v606_v56 = vrot.slane %v559_v51, %v605_v44 }
 0x268   :  { %v620_v61 = vrot.slane %v561_v54, %v619_v50  ;;  %v524_v62 = vpop.xlane.xlu1 %523  ;;  %v689_v50 = vsub.s32 %v686_v39, %v1170_v32 }
 0x269   :  { %v608_v0 = vsel %vm607_vm3, %v606_v56, %v601_v60  ;;  %v562_v1 = vadd.f32 %v1176_v34, %v524_v62  ;;  %v527_v2 = vpop.xlane.xlu0 %526  ;;  %v696_v56 = vsub.s32 %v693_v46, %v1170_v32 }
 0x26a   :  { %v615_v3 = vsel %vm614_vm4, %v613_v59, %v608_v0  ;;  %v563_v4 = vadd.f32 %v1176_v34, %v527_v2 }
 0x26b   :  { %v622_v5 = vsel %vm621_vm5, %v620_v61, %v615_v3  ;;  %v627_v6 = vrot.slane %v562_v1, %v626_v55 }
 0x26c   :  { %v634_v9 = vrot.slane %v563_v4, %v633_v57  ;;  %v530_v11 = vpop.xlane.xlu1 %529 }
 0x26d   :  { %v629_v10 = vsel %vm628_vm6, %v627_v6, %v622_v5  ;;  %v564_v14 = vadd.f32 %v1176_v34, %v530_v11  ;;  %v533_v15 = vpop.xlane.xlu0 %532 }
 0x26e   :  { %v565_v16 = vadd.f32 %v1176_v34, %v533_v15  ;;  %v636_v20 = vsel %vm635_vm7, %v634_v9, %v629_v10 }
 0x26f   :  { %v641_v17 = vrot.slane %v564_v14, %v640_v7 }
 0x270   :  { %v648_v21 = vrot.slane %v565_v16, %v647_v12  ;;  %v536_v22 = vpop.xlane.xlu1 %535 }
 0x271   :  { %v643_v26 = vsel %vm642_vm8, %v641_v17, %v636_v20  ;;  %v566_v27 = vadd.f32 %v1176_v34, %v536_v22  ;;  %v539_v28 = vpop.xlane.xlu0 %538 }
 0x272   :  { %v567_v29 = vadd.f32 %v1176_v34, %v539_v28  ;;  %v650_v35 = vsel %vm649_vm9, %v648_v21, %v643_v26 }
 0x273   :  { %v655_v31 = vrot.slane %v566_v27, %v654_v18 }
 0x274   :  { %v662_v36 = vrot.slane %v567_v29, %v661_v24  ;;  %v542_v37 = vpop.xlane.xlu1 %541 }
 0x275   :  { %v657_v40 = vsel %vm656_vm10, %v655_v31, %v650_v35  ;;  %v568_v41 = vadd.f32 %v1176_v34, %v542_v37  ;;  %v545_v42 = vpop.xlane.xlu0 %544 }
 0x276   :  { %v569_v43 = vadd.f32 %v1176_v34, %v545_v42  ;;  %v664_v47 = vsel %vm663_vm11, %v662_v36, %v657_v40 }
 0x277   :  { %v669_v44 = vrot.slane %v568_v41, %v668_v33 }
 0x278   :  { %v676_v48 = vrot.slane %v569_v43, %v675_v38  ;;  %v548_v49 = vpop.xlane.xlu1 %547 }
 0x279   :  { %v671_v51 = vsel %vm670_vm12, %v669_v44, %v664_v47  ;;  %v570_v52 = vadd.f32 %v1176_v34, %v548_v49  ;;  %v551_v53 = vpop.xlane.xlu0 %550 }
 0x27a   :  { %v571_v54 = vadd.f32 %v1176_v34, %v551_v53  ;;  %v678_v57 = vsel %vm677_vm13, %v676_v48, %v671_v51 }
 0x27b   :  { %v683_v55 = vrot.slane %v570_v52, %v682_v45 }
 0x27c   :  { %v690_v58 = vrot.slane %v571_v54, %v689_v50  ;;  %v554_v59 = vpop.xlane.xlu1 %553 }
 0x27d   :  { %v572_v30 = vadd.f32 %v1176_v34, %v554_v59  ;;  %v685_v60 = vsel %vm684_vm14, %v683_v55, %v678_v57 }
 0x27e   :  { %v692_v62 = vsel %vm691_vm15, %v690_v58, %v685_v60 }
 0x27f   :  { %v697_v61 = vrot.slane %v572_v30, %v696_v56 }
 0x281   :  { %v699_v63 = vsel %vm698_vm0, %v697_v61, %v692_v62 }
 0x282   :  { %701 = vst [vmem:[#allocation3] sm:$0x1] %v699_v63 }
 0x283   :  { %937 = shalt.err (!%p934_p4)
}
 0x284   :  { %s938_s28 = scalar_lea.hbm %s1245_s7, 16 }
 0x285   :  { %p939_p5 = scmp.ne.s32.totalorder %s1245_s7, %s938_s28  ;;  %p942_p6 = scmp.lt.u32.totalorder %s938_s28, %s1245_s7 }
 0x287   :  { %p944_p7 = pnand %p942_p6, %p939_p5 }
 0x289   :  { %947 = shalt.err (!%p944_p7)
}
 0x28a   :  { %711 = dma.vmem_to_hbm [thread:$0]  %s709_s23, 16, %s1245_s7, [#allocation4]  }
 0x28b   :  { %948 = dma.done.wait [#allocation4], 16  }
 0x28c   :  { %949 = vsyncadd [#allocation4], 4294967280 }
 0x28d   :  { %715 = vsyncpa [#allocation4], 1 }

</bundles_post_ra>
